<compile_context>
chip_gen: v6e
topology: v6e:2x2x1
jax: 0.10.0
libtpu: 0.0.40
codegen_flags: <defaults>
</compile_context>

<pallas_src>
import jax
import jax.numpy as jnp
from jax.experimental import pallas as pl
from jax.experimental.pallas import tpu as pltpu


def _round_up(x, m):
    return (x + m - 1) // m * m


def learned_mixin_kernel(hidden_ref, logits_ref, bias_ref, labels_ref, w_ref, b_ref,
                         y_ref, nll_ref, ent_ref):
    TB, C = logits_ref.shape

    # ---- log_softmax of the main-model logits (class axis) ----
    logits = logits_ref[...].astype(jnp.float32)                       # [TB, C]
    lm = jnp.max(logits, axis=1, keepdims=True)
    ls = logits - lm
    llse = jnp.log(jnp.sum(jnp.exp(ls), axis=1, keepdims=True))
    log_probs = ls - llse                                              # [TB, C]

    # ---- factor = softplus(Linear(hidden)): VPU multiply + lane reduce ----
    # (MXU matvec is an option once the hidden stream is bf16; VALU slot has
    #  slack here because the kernel is HBM-bound on `hidden`.)
    h = hidden_ref[...].astype(jnp.float32)                            # [TB, H]
    w = w_ref[...].astype(jnp.float32)                                 # [1, H]
    factor = jnp.sum(h * w, axis=1, keepdims=True) + b_ref[0, 0]       # [TB, 1]
    factor = jax.nn.softplus(factor)

    # ---- scaled bias + per-row entropy of softmax(bias) (algebraic form) ----
    # ent = -sum(p * log p) = log(bsum) - sum(bexp * bs) / bsum
    bias = bias_ref[...].astype(jnp.float32) * factor                  # [TB, C]
    bm = jnp.max(bias, axis=1, keepdims=True)
    bs = bias - bm
    bexp = jnp.exp(bs)
    bsum = jnp.sum(bexp, axis=1, keepdims=True)                        # [TB, 1]
    inv_bsum = pl.reciprocal(bsum, approx=True)                        # EUP slot
    ent_ref[...] = (jnp.log(bsum)
                    - jnp.sum(bexp * bs, axis=1, keepdims=True) * inv_bsum)

    # ---- y = log_softmax(logits) + bias  (module output) ----
    y = log_probs + bias
    y_ref[...] = y.astype(y_ref.dtype)

    # ---- per-row NLL of log_softmax(y) at `labels` (no full ylp temp) ----
    ym = jnp.max(y, axis=1, keepdims=True)
    ylse = ym + jnp.log(jnp.sum(jnp.exp(y - ym), axis=1, keepdims=True))   # [TB, 1]
    labels = labels_ref[...]                                           # [TB, 1] int32
    col = jax.lax.broadcasted_iota(jnp.int32, (TB, C), 1)
    y_at_label = jnp.sum(y * (col == labels).astype(jnp.float32),
                         axis=1, keepdims=True)                        # [TB, 1]
    nll_ref[...] = ylse - y_at_label


def _choose_block_b(B, H, C, hidden_dtype, logits_dtype, bias_dtype, block_b):
    hb = jnp.dtype(hidden_dtype).itemsize
    lb = max(jnp.dtype(logits_dtype).itemsize, jnp.dtype(bias_dtype).itemsize)
    # Sublane multiple of the narrowest streamed dtype (bf16 -> 16, int8 -> 32).
    min_item = min(hb, jnp.dtype(logits_dtype).itemsize, jnp.dtype(bias_dtype).itemsize)
    sub = {4: 8, 2: 16, 1: 32}.get(min_item, 8)

    if block_b is not None:
        tb = max(sub, _round_up(int(block_b), sub))
    else:
        # Conservative per-row VMEM working set (double-buffered pipeline blocks
        # + live in-kernel f32 temporaries).
        per_row = (2 * H * hb          # hidden double buffer (native dtype on the wire)
                   + 2 * H * 4         # f32 cast / product temps for the factor reduce
                   + 4 * C * lb        # logits + bias double buffers
                   + 2 * C * 4         # y output double buffer (f32)
                   + 12 * C * 4        # live [TB, C] f32 class-axis temporaries
                   + 64)               # labels block + per-row scalars
        budget = 36 * 1024 * 1024      # fits v7x (64 MiB phys) with headroom; ample on v5e/v6e
        tb = budget // per_row
        tb = min(tb, 2048)                            # amortize ~0.35 us/step overhead
        tb = min(tb, _round_up(pl.cdiv(B, 2), sub))   # >=2 grid steps -> both v7x TCs busy
        tb = max(sub, (tb // sub) * sub)
    return int(min(tb, _round_up(B, sub)))


def learned_mixin(hidden, logits, bias, labels, w, b, *, penalty=0.03, block_b=None):
    """Returns (loss, y) matching LearnedMixin.forward.

    hidden: [B, H] (any float dtype; streamed natively, cast to f32 in-kernel),
    logits/bias: [B, C], labels: [B] int, w: [1, H] (nn.Linear weight layout),
    b: [1, 1].
    """
    B, C = logits.shape
    H = hidden.shape[1]

    TB = _choose_block_b(B, H, C, hidden.dtype, logits.dtype, bias.dtype, block_b)
    num_tiles = pl.cdiv(B, TB)          # partial last block; no wrapper-side pad copies

    labels2d = labels.astype(jnp.int32).reshape(B, 1)
    w = jnp.asarray(w, jnp.float32).reshape(1, H)
    b = jnp.asarray(b, jnp.float32).reshape(1, 1)

    cost = pl.CostEstimate(
        flops=B * (2 * H + 32 * C),
        transcendentals=B * (3 * C + 6),
        bytes_accessed=(B * (H * jnp.dtype(hidden.dtype).itemsize
                             + 2 * C * jnp.dtype(logits.dtype).itemsize
                             + 4 * C + 12)
                        + 4 * (H + 1)),
    )

    y, nll, ent = pl.pallas_call(
        learned_mixin_kernel,
        grid=(num_tiles,),
        out_shape=(
            jax.ShapeDtypeStruct((B, C), jnp.float32),   # y
            jax.ShapeDtypeStruct((B, 1), jnp.float32),   # per-row NLL
            jax.ShapeDtypeStruct((B, 1), jnp.float32),   # per-row entropy
        ),
        in_specs=[
            pl.BlockSpec((TB, H), lambda i: (i, 0)),            # hidden tile (native dtype)
            pl.BlockSpec((TB, C), lambda i: (i, 0)),            # logits tile
            pl.BlockSpec((TB, C), lambda i: (i, 0)),            # bias tile
            pl.BlockSpec((TB, 1), lambda i: (i, 0)),            # labels tile
            pl.BlockSpec((1, H), lambda i: (0, 0)),             # w (grid-invariant)
            pl.BlockSpec(memory_space=pltpu.MemorySpace.SMEM),  # b scalar
        ],
        out_specs=(
            pl.BlockSpec((TB, C), lambda i: (i, 0)),
            pl.BlockSpec((TB, 1), lambda i: (i, 0)),
            pl.BlockSpec((TB, 1), lambda i: (i, 0)),
        ),
        compiler_params=pltpu.CompilerParams(
            dimension_semantics=("parallel",),
            vmem_limit_bytes=48 * 1024 * 1024,
        ),
        cost_estimate=cost,
    )(hidden, logits, bias, labels2d, w, b)

    # Final combine in the wrapper (keeps the grid axis fully parallel).
    loss = jnp.mean(nll[:, 0]) + penalty * jnp.mean(ent[:, 0])
    return loss, y


def _reference(hidden, logits, bias, labels, w, b, penalty=0.03):
    logits = logits.astype(jnp.float32)
    log_probs = jax.nn.log_softmax(logits, axis=1)
    factor = jax.nn.softplus(hidden.astype(jnp.float32) @ w.reshape(-1, 1) + b)
    bias = bias.astype(jnp.float32) * factor
    bias_lp = jax.nn.log_softmax(bias, axis=1)
    entropy = -jnp.mean(jnp.sum(jnp.exp(bias_lp) * bias_lp, axis=1))
    y = log_probs + bias
    ylp = jax.nn.log_softmax(y, axis=1)
    nll = -jnp.take_along_axis(ylp, labels[:, None], axis=1)[:, 0]
    return jnp.mean(nll) + penalty * entropy, y


if __name__ == "__main__":
    # B deliberately NOT a multiple of the tile size -> exercises the masked
    # partial last block (no wrapper pad).  H=768 is fixed by nn.Linear(768, 1).
    B, H, C = 10, 768, 4
    key = jax.random.PRNGKey(0)
    k1, k2, k3, k4, k5, k6 = jax.random.split(key, 6)

    hidden = jax.random.normal(k1, (B, H), dtype=jnp.float32)
    logits = jax.random.normal(k2, (B, C), dtype=jnp.float32)
    bias_in = jax.random.normal(k3, (B, C), dtype=jnp.float32)
    labels = jax.random.randint(k4, (B,), 0, C, dtype=jnp.int32)

    # nn.Linear(768, 1) parameters in PyTorch weight layout: w [1, H], b [1, 1].
    bound = 1.0 / jnp.sqrt(jnp.float32(H))
    w = jax.random.uniform(k5, (1, H), jnp.float32, -bound, bound)
    b = jax.random.uniform(k6, (1, 1), jnp.float32, -bound, bound)

    loss, y = learned_mixin(hidden, logits, bias_in, labels, w, b, penalty=0.03)
    jax.block_until_ready((loss, y))

    ref_loss, ref_y = _reference(hidden, logits, bias_in, labels, w, b, penalty=0.03)
    assert jnp.allclose(loss, ref_loss, atol=1e-4, rtol=1e-4), (loss, ref_loss)
    assert jnp.allclose(y, ref_y, atol=1e-4, rtol=1e-4)

    print("KERNEL_OK")
</pallas_src>

<mosaic_0001>
module attributes {stable_mosaic.version = 11 : i64} {
  func.func @learned_mixin_kernel(%arg0: i32, %arg1: memref<8x768xf32, #tpu.memory_space<vmem>>, %arg2: memref<8x4xf32, #tpu.memory_space<vmem>>, %arg3: memref<8x4xf32, #tpu.memory_space<vmem>>, %arg4: memref<8x1xi32, #tpu.memory_space<vmem>>, %arg5: memref<1x768xf32, #tpu.memory_space<vmem>>, %arg6: memref<1x1xf32, #tpu.memory_space<smem>>, %arg7: memref<8x4xf32, #tpu.memory_space<vmem>>, %arg8: memref<8x1xf32, #tpu.memory_space<vmem>>, %arg9: memref<8x1xf32, #tpu.memory_space<vmem>>) attributes {dimension_semantics = [#tpu.dimension_semantics<parallel>], iteration_bounds = array<i64: 2>, scalar_prefetch = 0 : i64, scratch_operands = 0 : i64, tpu.core_type = #tpu.core_type<tc>, window_params = [{transform_indices = @transform_0, window_bounds = array<i64: 8, 768>}, {transform_indices = @transform_1, window_bounds = array<i64: 8, 4>}, {transform_indices = @transform_2, window_bounds = array<i64: 8, 4>}, {transform_indices = @transform_3, window_bounds = array<i64: 8, 1>}, {pipeline_mode = #tpu.pipeline_mode<synchronous>, transform_indices = @transform_4, window_bounds = array<i64: 1, 768>}, {transform_indices = @transform_5, window_bounds = array<i64: 1, 1>}, {transform_indices = @transform_6, window_bounds = array<i64: 8, 4>}, {transform_indices = @transform_7, window_bounds = array<i64: 8, 1>}, {transform_indices = @transform_8, window_bounds = array<i64: 8, 1>}]} {
    %c0 = arith.constant 0 : index
    %c0_0 = arith.constant 0 : index
    %0 = vector.load %arg2[%c0, %c0_0] : memref<8x4xf32, #tpu.memory_space<vmem>>, vector<8x4xf32>
    %cst = arith.constant dense<0xFF800000> : vector<8xf32>
    %1 = vector.multi_reduction <maximumf>, %0, %cst [1] : vector<8x4xf32> to vector<8xf32>
    %2 = vector.shape_cast %1 : vector<8xf32> to vector<8x1xf32>
    %3 = vector.broadcast %2 : vector<8x1xf32> to vector<8x4xf32>
    %4 = arith.subf %0, %3 : vector<8x4xf32>
    %5 = math.exp %4 : vector<8x4xf32>
    %cst_1 = arith.constant dense<0.000000e+00> : vector<8xf32>
    %6 = vector.multi_reduction <add>, %5, %cst_1 [1] : vector<8x4xf32> to vector<8xf32>
    %7 = vector.shape_cast %6 : vector<8xf32> to vector<8x1xf32>
    %8 = math.log %7 : vector<8x1xf32>
    %9 = vector.broadcast %8 : vector<8x1xf32> to vector<8x4xf32>
    %10 = arith.subf %4, %9 : vector<8x4xf32>
    %c0_2 = arith.constant 0 : index
    %c0_3 = arith.constant 0 : index
    %11 = vector.load %arg1[%c0_2, %c0_3] : memref<8x768xf32, #tpu.memory_space<vmem>>, vector<8x768xf32>
    %c0_4 = arith.constant 0 : index
    %c0_5 = arith.constant 0 : index
    %12 = vector.load %arg5[%c0_4, %c0_5] : memref<1x768xf32, #tpu.memory_space<vmem>>, vector<1x768xf32>
    %13 = vector.broadcast %12 : vector<1x768xf32> to vector<8x768xf32>
    %14 = arith.mulf %11, %13 : vector<8x768xf32>
    %cst_6 = arith.constant dense<0.000000e+00> : vector<8xf32>
    %15 = vector.multi_reduction <add>, %14, %cst_6 [1] : vector<8x768xf32> to vector<8xf32>
    %16 = vector.shape_cast %15 : vector<8xf32> to vector<8x1xf32>
    %c0_7 = arith.constant 0 : index
    %c0_8 = arith.constant 0 : index
    %17 = memref.load %arg6[%c0_7, %c0_8] : memref<1x1xf32, #tpu.memory_space<smem>>
    %18 = vector.broadcast %17 : f32 to vector<8x1xf32>
    %19 = arith.addf %16, %18 : vector<8x1xf32>
    %cst_9 = arith.constant 0.000000e+00 : f32
    %20 = vector.broadcast %cst_9 : f32 to vector<8x1xf32>
    %21 = arith.maximumf %19, %20 : vector<8x1xf32>
    %22 = vector.broadcast %cst_9 : f32 to vector<8x1xf32>
    %23 = arith.subf %19, %22 : vector<8x1xf32>
    %24 = arith.cmpf one, %23, %23 : vector<8x1xf32>
    %25 = vector.broadcast %cst_9 : f32 to vector<8x1xf32>
    %26 = arith.addf %19, %25 : vector<8x1xf32>
    %27 = math.absf %23 : vector<8x1xf32>
    %cst_10 = arith.constant 0.000000e+00 : f32
    %28 = vector.broadcast %cst_10 : f32 to vector<8x1xf32>
    %29 = arith.subf %28, %27 : vector<8x1xf32>
    %30 = math.exp %29 : vector<8x1xf32>
    %31 = math.log1p %30 : vector<8x1xf32>
    %32 = arith.addf %21, %31 : vector<8x1xf32>
    %33 = arith.select %24, %26, %32 : vector<8x1xi1>, vector<8x1xf32>
    %c0_11 = arith.constant 0 : index
    %c0_12 = arith.constant 0 : index
    %34 = vector.load %arg3[%c0_11, %c0_12] : memref<8x4xf32, #tpu.memory_space<vmem>>, vector<8x4xf32>
    %35 = vector.broadcast %33 : vector<8x1xf32> to vector<8x4xf32>
    %36 = arith.mulf %34, %35 : vector<8x4xf32>
    %cst_13 = arith.constant dense<0xFF800000> : vector<8xf32>
    %37 = vector.multi_reduction <maximumf>, %36, %cst_13 [1] : vector<8x4xf32> to vector<8xf32>
    %38 = vector.shape_cast %37 : vector<8xf32> to vector<8x1xf32>
    %39 = vector.broadcast %38 : vector<8x1xf32> to vector<8x4xf32>
    %40 = arith.subf %36, %39 : vector<8x4xf32>
    %41 = math.exp %40 : vector<8x4xf32>
    %cst_14 = arith.constant dense<0.000000e+00> : vector<8xf32>
    %42 = vector.multi_reduction <add>, %41, %cst_14 [1] : vector<8x4xf32> to vector<8xf32>
    %43 = vector.shape_cast %42 : vector<8xf32> to vector<8x1xf32>
    %44 = tpu.reciprocal %43 {approx = true} : vector<8x1xf32> -> vector<8x1xf32>
    %45 = math.log %43 : vector<8x1xf32>
    %46 = arith.mulf %41, %40 : vector<8x4xf32>
    %cst_15 = arith.constant dense<0.000000e+00> : vector<8xf32>
    %47 = vector.multi_reduction <add>, %46, %cst_15 [1] : vector<8x4xf32> to vector<8xf32>
    %48 = vector.shape_cast %47 : vector<8xf32> to vector<8x1xf32>
    %49 = arith.mulf %48, %44 : vector<8x1xf32>
    %50 = arith.subf %45, %49 : vector<8x1xf32>
    %c0_16 = arith.constant 0 : index
    %c0_17 = arith.constant 0 : index
    %51 = vector.load %arg9[%c0_16, %c0_17] : memref<8x1xf32, #tpu.memory_space<vmem>>, vector<8x1xf32>
    tpu.vector_store %arg9[%c0_16, %c0_17], %50 {strides = array<i32>} : memref<8x1xf32, #tpu.memory_space<vmem>>, vector<8x1xf32>,
    %52 = arith.addf %10, %36 : vector<8x4xf32>
    %c0_18 = arith.constant 0 : index
    %c0_19 = arith.constant 0 : index
    %53 = vector.load %arg7[%c0_18, %c0_19] : memref<8x4xf32, #tpu.memory_space<vmem>>, vector<8x4xf32>
    tpu.vector_store %arg7[%c0_18, %c0_19], %52 {strides = array<i32>} : memref<8x4xf32, #tpu.memory_space<vmem>>, vector<8x4xf32>,
    %cst_20 = arith.constant dense<0xFF800000> : vector<8xf32>
    %54 = vector.multi_reduction <maximumf>, %52, %cst_20 [1] : vector<8x4xf32> to vector<8xf32>
    %55 = vector.shape_cast %54 : vector<8xf32> to vector<8x1xf32>
    %56 = vector.broadcast %55 : vector<8x1xf32> to vector<8x4xf32>
    %57 = arith.subf %52, %56 : vector<8x4xf32>
    %58 = math.exp %57 : vector<8x4xf32>
    %cst_21 = arith.constant dense<0.000000e+00> : vector<8xf32>
    %59 = vector.multi_reduction <add>, %58, %cst_21 [1] : vector<8x4xf32> to vector<8xf32>
    %60 = vector.shape_cast %59 : vector<8xf32> to vector<8x1xf32>
    %61 = math.log %60 : vector<8x1xf32>
    %62 = arith.addf %55, %61 : vector<8x1xf32>
    %c0_22 = arith.constant 0 : index
    %c0_23 = arith.constant 0 : index
    %63 = vector.load %arg4[%c0_22, %c0_23] : memref<8x1xi32, #tpu.memory_space<vmem>>, vector<8x1xi32>
    %64 = tpu.iota {dimensions = array<i32: 1>} : vector<8x4xi32>
    %65 = vector.broadcast %63 : vector<8x1xi32> to vector<8x4xi32>
    %66 = arith.cmpi eq, %64, %65 : vector<8x4xi32>
    %67 = arith.extui %66 : vector<8x4xi1> to vector<8x4xi32>
    %68 = arith.sitofp %67 : vector<8x4xi32> to vector<8x4xf32>
    %69 = arith.mulf %52, %68 : vector<8x4xf32>
    %cst_24 = arith.constant dense<0.000000e+00> : vector<8xf32>
    %70 = vector.multi_reduction <add>, %69, %cst_24 [1] : vector<8x4xf32> to vector<8xf32>
    %71 = vector.shape_cast %70 : vector<8xf32> to vector<8x1xf32>
    %72 = arith.subf %62, %71 : vector<8x1xf32>
    %c0_25 = arith.constant 0 : index
    %c0_26 = arith.constant 0 : index
    %73 = vector.load %arg8[%c0_25, %c0_26] : memref<8x1xf32, #tpu.memory_space<vmem>>, vector<8x1xf32>
    tpu.vector_store %arg8[%c0_25, %c0_26], %72 {strides = array<i32>} : memref<8x1xf32, #tpu.memory_space<vmem>>, vector<8x1xf32>,
    return
  }
  func.func @transform_0(%arg0: i32) -> (i32, i32) {
    %c0_i32 = arith.constant 0 : i32
    %c0_i32_0 = arith.constant 0 : i32
    return %arg0, %c0_i32 : i32, i32
  }
  func.func @transform_1(%arg0: i32) -> (i32, i32) {
    %c0_i32 = arith.constant 0 : i32
    %c0_i32_0 = arith.constant 0 : i32
    return %arg0, %c0_i32 : i32, i32
  }
  func.func @transform_2(%arg0: i32) -> (i32, i32) {
    %c0_i32 = arith.constant 0 : i32
    %c0_i32_0 = arith.constant 0 : i32
    return %arg0, %c0_i32 : i32, i32
  }
  func.func @transform_3(%arg0: i32) -> (i32, i32) {
    %c0_i32 = arith.constant 0 : i32
    %c0_i32_0 = arith.constant 0 : i32
    return %arg0, %c0_i32 : i32, i32
  }
  func.func @transform_4(%arg0: i32) -> (i32, i32) {
    %c0_i32 = arith.constant 0 : i32
    %c0_i32_0 = arith.constant 0 : i32
    %c0_i32_1 = arith.constant 0 : i32
    return %c0_i32, %c0_i32_0 : i32, i32
  }
  func.func @transform_5(%arg0: i32) -> (i32, i32) {
    %c0_i32 = arith.constant 0 : i32
    %c0_i32_0 = arith.constant 0 : i32
    %c0_i32_1 = arith.constant 0 : i32
    return %c0_i32, %c0_i32_0 : i32, i32
  }
  func.func @transform_6(%arg0: i32) -> (i32, i32) {
    %c0_i32 = arith.constant 0 : i32
    %c0_i32_0 = arith.constant 0 : i32
    return %arg0, %c0_i32 : i32, i32
  }
  func.func @transform_7(%arg0: i32) -> (i32, i32) {
    %c0_i32 = arith.constant 0 : i32
    %c0_i32_0 = arith.constant 0 : i32
    return %arg0, %c0_i32 : i32, i32
  }
  func.func @transform_8(%arg0: i32) -> (i32, i32) {
    %c0_i32 = arith.constant 0 : i32
    %c0_i32_0 = arith.constant 0 : i32
    return %arg0, %c0_i32 : i32, i32
  }
}

</mosaic_0001>

<bundles_post_ra>
// kernel: tpu_custom_call.1
= control target key start
LH: loop header
LB: loop body
LE: loop exit
PB: predicated region body
PF: predicated region fallthrough
CT: control target
= control target key end

     0   :  { %s1025_s0 = inlined_call_operand.hbm [shape: f32[10,768], index: 0, kind: input, shape index: {}]   ;;  %s1026_s1 = inlined_call_operand.vmem [shape: f32[10,4], index: 1, kind: input, shape index: {}]   ;;  %s1027_s2 = inlined_call_operand.vmem [shape: f32[10,4], index: 2, kind: input, shape index: {}]   ;;  %s1028_s3 = inlined_call_operand.vmem [shape: s32[10,1], index: 3, kind: input, shape index: {}]   ;;  %s1029_s4 = inlined_call_operand.vmem [shape: f32[1,768], index: 4, kind: input, shape index: {}]   ;;  %s1030_s5 = inlined_call_operand.<no memory space> [shape: f32[1,1], index: 5, kind: input, shape index: {}]   ;;  %s1031_s6 = inlined_call_operand.vmem [shape: f32[10,4], index: 6, kind: output, shape index: {0}]   ;;  %s1032_s7 = inlined_call_operand.vmem [shape: f32[10,1], index: 7, kind: output, shape index: {1}]   ;;  %s1033_s8 = inlined_call_operand.vmem [shape: f32[10,1], index: 8, kind: output, shape index: {2}]  }
   0x1   :  { %14 = sst [smem:[#allocation2]] %s1030_s5 }
   0x2   :  { %15 = vsyncpa [#allocation4], 0 }
   0x3   :  { %17 = vsyncpa [#allocation4 + $0x1], 0  ;;  %s888_s29 = smov 0   ;;  %s890_s30 = smov 0  }
   0x4   :  { %s892_s9 = smov 0   ;;  %s894_s10 = smov 0  }
   0x5 LB: > { %s907_s5 = sadd.s32 4294967295, %s835_s10   ;;  %s910_s11 = sadd.s32 1, %s835_s10   ;;  %s835_s10 = sphi %s894_s10, %s1042_s10   ;;  %s831_s9 = sphi %s892_s9, %s1041_s9   ;;  %s827_s30 = sphi %s890_s30, %s1040_s30   ;;  %s823_s29 = sphi %s888_s29, %s1039_s29  }
   0x6   : > { %s27_s12 = ssub.s32 %s835_s10, %s910_s11  ;;  %s30_s13 = sadd.s32 1, %s831_s9 }
   0x7   : > { %p28_p0 = scmp.eq.s32.totalorder %s27_s12, 0  ;;  %p37_p1 = scmp.ne.s32.totalorder %s831_s9, %s827_s30 }
   0x8   : > { %p38_p2 = scmp.eq.s32.totalorder %s835_s10, 0  ;;  %p43_p3 = scmp.ne.s32.totalorder %s827_s30, %s823_s29 }
   0x9   : > { %s920_s14 = scalar_select %p28_p0, %s831_s9, %s30_s13  }
   0xa   : > { %p39_p4 = por %p38_p2, %p37_p1  ;;  %p44_p5 = scmp.eq.s32.totalorder %s907_s5, 0 }
   0xb   : > { %p718_p6 = scmp.lt.s32.totalorder %s835_s10, 2  ;;  %s271_s16 = sand.u32 1, %s831_s9  }
   0xc   : > { %p924_p7 = por %p44_p5, %p43_p3  ;;  %s709_s17 = smul.u32 48, %s271_s16 }
   0xd   : > { %s710_s18 = smul.u32 768, %s835_s10  ;;  %p930_p8 = pnand %p718_p6, %p39_p4 }
   0xe   : > { %s1035_s15 = scalar_select %p924_p7, 1, 0 }
   0xf   : > { %s938_s22 = scalar_lea.hbm %s1025_s0, %s710_s18  ;;  %s275_s23 = scalar_lea.vmem [#allocation3], %s709_s17 }
  0x10   : > { %s283_s24 = sshll.u32 %s275_s23, 4  ;;  %s272_s25 = scalar_lea.sflag [#allocation4], %s271_s16  ;;  %s284_s24 = int_to_ptr.vmem [resolvable:$true] %s283_s24 }
  0x11   : > { %s773_s26 = scalar_lea.hbm %s938_s22, 768  ;;  %p775_p11 = pneg %p930_p8 }
  0x12   : > { %p774_p10 = scmp.ne.s32.totalorder %s938_s22, %s773_s26  ;;  %s778_s29 = scalar_lea.hbm %s1025_s0, 1536 }
  0x13   : > { %p779_p0 = scmp.lt.s32.totalorder %s938_s22, %s1025_s0  ;;  %p780_p1 = scmp.lt.s32.totalorder %s778_s29, %s773_s26 }
  0x14   : > { %p776_p12 = pnand %p775_p11, %p774_p10 }
  0x15   : > { %p781_p2 = por %p780_p1, %p779_p0 }
  0x16   : > { %p777_p13 = pneg %p776_p12 }
  0x18   : > { %p782_p3 = pnand %p781_p2, %p777_p13 }
  0x1a   : > { %785 = shalt.err (!%p782_p3)
}
  0x1b   : > { %s786_s17 = scalar_lea.vmem %s284_s24, 768  ;;  %s837_s16 = smov [#allocation3]  }
  0x1c   : > { %p787_p4 = scmp.ne.s32.totalorder %s284_s24, %s786_s17  ;;  %s791_s18 = sshll.u32 %s837_s16, 4  ;;  %s792_s18 = int_to_ptr.vmem [resolvable:$false] %s791_s18 }
  0x1d   : > { %s793_s20 = scalar_lea.vmem %s792_s18, 1536  ;;  %p794_p10 = scmp.lt.s32.totalorder %s284_s24, %s792_s18 }
  0x1e   : > { %p789_p5 = pnand %p787_p4, %p775_p11  ;;  %p795_p12 = scmp.lt.s32.totalorder %s793_s20, %s786_s17 }
  0x20   : > { %p790_p6 = pneg %p789_p5  ;;  %p796_p9 = por %p795_p12, %p794_p10 }
  0x22   : > { %p797_p7 = pnand %p796_p9, %p790_p6 }
  0x24   : > { %800 = shalt.err (!%p797_p7)
}
  0x25   : > { %717 = dma.hbm_to_vmem [thread:$0]  (!%p930_p8), %s938_s22, 768, %s284_s24, %s272_s25  }
  0x26   : > { %p309_p13 = scmp.lt.s32.totalorder %s835_s10, 3  ;;  %p1037_p0 = scmp.ge.s32.totalorder %s835_s10, 1 }
  0x28   : > { %p310_p1 = pnand %p1037_p0, %p309_p13 }
  0x29   : > { %s315_s21 = sand.u32 (!%p310_p1), 1, %s827_s30   ;;  %p1038_p11 = scmp.ne.s32.totalorder (!%p310_p1), %s1035_s15, 0 }
  0x2a   : > { %313 = sbr.rel (%p310_p1) target bundleno = 690 (0x2b2), region = 44  ;;  %s316_s26 = scalar_lea.sflag (!%p310_p1), [#allocation4], %s315_s21 }
  0x2b   : > { %s711_s23 = smul.u32 (!%p310_p1), 48, %s315_s21 }
  0x2d   : > { %s958_s27 = scalar_lea.vmem (!%p310_p1), [#allocation3], %s711_s23 }
  0x2f   : > { %818 = dma.done.wait (%p1038_p11), %s316_s26, 768  }
  0x30   : > { %820 = vsyncadd (%p1038_p11), %s316_s26, 4294966528  ;;  %p371_p7 = scmp.lt.s32.totalorder %s907_s5, 1  ;;  %v417_v0 = vlaneseq  ;;  %vm396_vm0 = vcmask 31744   ;;  %v409_v8 = vld [vmem:[%s958_s27] sm:$0xff]  ;;  %v410_v10 = vld [vmem:[%s958_s27 + $0x8] sm:$0xff]  ;;  %s460_s25 = sld [smem:[#allocation2]] }
  0x31   : > { %v411_v11 = vld [vmem:[%s958_s27 + $0x10] sm:$0xff]  ;;  %v412_v18 = vld [vmem:[%s958_s27 + $0x18] sm:$0xff]  ;;  %v413_v23 = vld [vmem:[%s958_s27 + $0x20] sm:$0xff]  ;;  %v838_v51 = vmov 0   ;;  %vm501_vm4 = vcmask 7168  }
  0x32   : > { %s1044_s5 = smov (!%p371_p7, %s907_s5), 1  ;;  %v418_v1 = vshrl.u32 %v417_v0, 7  ;;  %v415_v12 = vld [vmem:[%s1029_s4] sm:$0x3f]  ;;  %v414_v27 = vld [vmem:[%s958_s27 + $0x28] sm:$0xff]  ;;  %753 = vset.pattern.permute.xlu1 %v838_v51  ;;  %754 = vset.pattern.permute.xlu0 %v838_v51 }
  0x33   : > { %s967_s10 = sshll.u32 %s1044_s5, 3 }
  0x34   : > { %s374_s24 = scalar_lea.vmem %s1026_s1, %s967_s10  ;;  %v419_v2 = vsub.s32 0, %v418_v1  ;;  %v423_v3 = vsub.s32 1, %v418_v1  ;;  %v427_v4 = vsub.s32 2, %v418_v1  ;;  %v431_v5 = vsub.s32 3, %v418_v1  ;;  %s378_s12 = scalar_lea.vmem %s1027_s2, %s967_s10 }
  0x35   : > { %v395_v6 = vld [vmem:[%s374_s24] sm:$0xff]  ;;  %v435_v9 = vsub.s32 4, %v418_v1  ;;  %v439_v13 = vsub.s32 5, %v418_v1  ;;  %s386_s16 = scalar_lea.vmem %s1031_s6, %s967_s10  ;;  %s382_s21 = scalar_lea.vmem %s1028_s3, %s967_s10 }
  0x36   : > { %v397_v7 = vsel %vm396_vm0, %v395_v6, -inf  ;;  %v420_v14 = vrot.slane %v415_v12, %v419_v2  ;;  %v424_v15 = vrot.slane %v415_v12, %v423_v3  ;;  %v428_v16 = vrot.slane %v415_v12, %v427_v4  ;;  %v481_v57 = vld [vmem:[%s378_s12] sm:$0xff]  ;;  %s390_s27 = scalar_lea.vmem %s1032_s7, %s967_s10  ;;  %s394_s24 = scalar_lea.vmem %s1033_s8, %s967_s10 }
  0x37   : > { %398 = vmax.xlane.f32.xlu0 %v397_v7  ;;  %v432_v17 = vrot.slane %v415_v12, %v431_v5  ;;  %v436_v19 = vrot.slane %v415_v12, %v435_v9  ;;  %v440_v24 = vrot.slane %v415_v12, %v439_v13  ;;  %v461_v37 = vstv %s460_s25  ;;  %v517_v4 = vld [vmem:[%s382_s21] sm:$0xff] }
  0x38   : > { %v447_v20 = vmul.f32 %v420_v14, %v409_v8  ;;  %v448_v21 = vmul.f32 %v424_v15, %v410_v10  ;;  %v449_v22 = vmul.f32 %v428_v16, %v411_v11  ;;  %v519_v11 = vand.u32 127, %v417_v0 }
  0x39   : > { %v450_v25 = vmul.f32 %v432_v17, %v412_v18  ;;  %v451_v28 = vmul.f32 %v436_v19, %v413_v23  ;;  %v452_v30 = vmul.f32 %v440_v24, %v414_v27  ;;  %v839_v18 = vmov 0.0  }
  0x3a   : > { %v453_v26 = vadd.f32 %v448_v21, %v447_v20 }
  0x3c   : > { %v454_v29 = vadd.f32 %v453_v26, %v449_v22 }
  0x3e   : > { %v455_v31 = vadd.f32 %v454_v29, %v450_v25 }
  0x40   : > { %v456_v32 = vadd.f32 %v455_v31, %v451_v28 }
  0x42   : > { %v457_v33 = vadd.f32 %v456_v32, %v452_v30 }
  0x44   : > { %458 = vadd.xlane.f32.xlu0 %v457_v33 }
  0xc0   : > { %v399_v34 = vpop.xlane.xlu0 %398 }
  0xc1   : > { %v400_v35 = vsub.f32 %v395_v6, %v399_v34 }
  0xc3   : > { %v401_v36 = vmul.f32 1.442695, %v400_v35 }
  0xc5   : > { %755 = vpow2.f32 %v401_v36 }
  0xcd   : > { %v459_v38 = vpop.xlane.xlu0 %458 }
  0xce   : > { %v462_v39 = vadd.f32 %v461_v37, %v459_v38 }
  0xd0   : > { %v466_v41 = vand.u32 2147483647, %v462_v39  ;;  %v463_v53 = vmax.f32 %v462_v39, 0.0  ;;  %vm464_vm2 = vcmp.ne.f32.partialorder %v462_v39, %v462_v39 }
  0xd2   : > { %v756_v40 = vpop.eup %755  ;;  %v467_v43 = vsub.f32 0.0, %v466_v41 }
  0xd3   : > { %v403_v42 = vsel %vm396_vm0, %v756_v40, 0.0 }
  0xd4   : > { %404 = vadd.xlane.f32.xlu1 %v403_v42  ;;  %v468_v44 = vmul.f32 1.442695, %v467_v43 }
  0xd6   : > { %757 = vpow2.f32 %v468_v44 }
  0xe3   : > { %v758_v45 = vpop.eup %757 }
  0xe4   : > { %v470_v46 = vadd.f32 1.0, %v758_v45  ;;  %v473_v47 = vmul.f32 -0.5, %v758_v45  ;;  %v476_v49 = vand.u32 2147483647, %v758_v45 }
  0xe6   : > { %759 = vlog2.f32 %v470_v46  ;;  %v474_v48 = vadd.f32 1.0, %v473_v47  ;;  %vm477_vm1 = vcmp.lt.f32.partialorder %v476_v49, 0.0004427343 }
  0xe8   : > { %v475_v50 = vmul.f32 %v758_v45, %v474_v48 }
  0xf3   : > { %v760_v52 = vpop.eup %759 }
  0xf4   : > { %v472_v54 = vmul.f32 0.6931472, %v760_v52 }
  0xf6   : > { %v478_v55 = vsel %vm477_vm1, %v475_v50, %v472_v54 }
  0xf7   : > { %v479_v56 = vadd.f32 %v478_v55, %v463_v53 }
  0xf9   : > { %v480_v58 = vsel %vm464_vm2, %v462_v39, %v479_v56 }
  0xfa   : > { %v482_v59 = vmul.f32 %v481_v57, %v480_v58 }
  0xfc   : > { %v483_v60 = vsel %vm396_vm0, %v482_v59, -inf }
  0xfd   : > { %484 = vmax.xlane.f32.xlu0 %v483_v60 }
 0x15d   : > { %v405_v61 = vpop.xlane.xlu1 %404 }
 0x15e   : > { %761 = vlog2.f32 %v405_v61 }
 0x16b   : > { %v762_v62 = vpop.eup %761 }
 0x16c   : > { %v407_v63 = vmul.f32 0.6931472, %v762_v62 }
 0x16e   : > { %v408_v1 = vsub.f32 %v400_v35, %v407_v63 }
 0x170   : > { %v503_v2 = vadd.f32 %v482_v59, %v408_v1 }
 0x172   : > { %504 = vst.msk [vmem:[%s386_s16] sm:$0xff] %vm396_vm0, %v503_v2  ;;  %v505_v3 = vsel %vm396_vm0, %v503_v2, -inf }
 0x173   : > { %506 = vmax.xlane.f32.xlu1 %v505_v3 }
 0x184   : > { %521 = vperm.xlu1 %753, %v517_v4  }
 0x186   : > { %v485_v5 = vpop.xlane.xlu0 %484 }
 0x187   : > { %v486_v6 = vsub.f32 %v482_v59, %v485_v5 }
 0x189   : > { %v487_v9 = vmul.f32 1.442695, %v486_v6 }
 0x1fc   : > { %v507_v7 = vpop.xlane.xlu1 %506 }
 0x1fd   : > { %v508_v8 = vsub.f32 %v503_v2, %v507_v7 }
 0x1ff   : > { %v509_v10 = vmul.f32 1.442695, %v508_v8 }
 0x200   : > { %v522_v13 = vpop.permute.xlu1 %521 }
 0x201   : > { %763 = vpow2.f32 %v509_v10  ;;  %vm523_vm3 = vcmp.eq.s32.totalorder %v519_v11, %v522_v13 }
 0x202   : > { %765 = vpow2.f32 %v487_v9  ;;  %v706_v19 = vsel %vm523_vm3, 1.0, %v839_v18 }
 0x203   : > { %v526_v21 = vmul.f32 %v706_v19, %v503_v2 }
 0x205   : > { %v527_v0 = vsel %vm396_vm0, %v526_v21, 0.0 }
 0x20e   : > { %v764_v12 = vpop.eup %763 }
 0x20f   : > { %v511_v14 = vsel %vm396_vm0, %v764_v12, 0.0  ;;  %v766_v15 = vpop.eup %765 }
 0x210   : > { %512 = vadd.xlane.f32.xlu0 %v511_v14  ;;  %v489_v16 = vsel %vm396_vm0, %v766_v15, 0.0  ;;  %v495_v17 = vmul.f32 %v766_v15, %v486_v6 }
 0x212   : > { %v496_v20 = vsel %vm396_vm0, %v495_v17, 0.0 }
 0x214   : > { %490 = vadd.xlane.f32.xlu0 %v489_v16 }
 0x218   : > { %497 = vadd.xlane.f32.xlu0 %v496_v20 }
 0x21c   : > { %528 = vadd.xlane.f32.xlu0 %v527_v0 }
 0x299   : > { %v513_v22 = vpop.xlane.xlu0 %512 }
 0x29a   : > { %767 = vlog2.f32 %v513_v22 }
 0x29d   : > { %v491_v23 = vpop.xlane.xlu0 %490 }
 0x29e   : > { %769 = vrcp.f32 %v491_v23 }
 0x29f   : > { %771 = vlog2.f32 %v491_v23 }
 0x2a1   : > { %v498_v24 = vpop.xlane.xlu0 %497 }
 0x2a5   : > { %v529_v29 = vpop.xlane.xlu0 %528 }
 0x2a7   : > { %v768_v25 = vpop.eup %767 }
 0x2a8   : > { %v515_v26 = vmul.f32 0.6931472, %v768_v25 }
 0x2aa   : > { %v516_v27 = vadd.f32 %v515_v26, %v507_v7 }
 0x2ab   : > { %v770_v28 = vpop.eup %769 }
 0x2ac   : > { %v772_v30 = vpop.eup %771  ;;  %v499_v31 = vmul.f32 %v770_v28, %v498_v24  ;;  %v530_v32 = vsub.f32 %v516_v27, %v529_v29 }
 0x2ad   : > { %v494_v33 = vmul.f32 0.6931472, %v772_v30 }
 0x2ae   : > { %531 = vst.msk [vmem:[%s390_s27] sm:$0xff] %vm501_vm4, %v530_v32 }
 0x2af   : > { %v500_v34 = vsub.f32 %v494_v33, %v499_v31 }
 0x2b1   : > { %502 = vst.msk [vmem:[%s394_s24] sm:$0xff] %vm501_vm4, %v500_v34 }
 0x2b2 PF: > { %p20_p8 = scmp.ge.s32.totalorder %s910_s11, 4   ;;  %s1039_s29 = smov %s827_s30 }
 0x2b3   : > { %s1040_s30 = smov %s831_s9  ;;  %s1041_s9 = smov %s920_s14 }
 0x2b4   : > { %s1042_s10 = smov %s910_s11  ;;  %22 = sbr.rel (!%p20_p8) target bundleno = 5 (0x5), region = 117 }
 0x2b9   :  { %579 = vsyncpa [#allocation4], 1 }
 0x2ba   :  { %581 = vsyncpa [#allocation4 + $0x1], 1 }

</bundles_post_ra>
